<compile_context>
chip_gen: v7x
topology: tpu7x:2x2x1
jax: 0.10.0
libtpu: 0.0.40
codegen_flags: <defaults>
</compile_context>

<pallas_src>
import functools
import math

import jax
import jax.numpy as jnp
from jax.experimental import pallas as pl
from jax.experimental.pallas import tpu as pltpu

_LANES = 128
_DEFAULT_BLOCK_BYTES = 8 * 1024 * 1024  # per-block VMEM footprint target


def _round_up(x: int, m: int) -> int:
    return ((x + m - 1) // m) * m


def _num_tensorcores() -> int:
    """Best-effort TensorCore-per-chip count (1 on v5e/v6e, 2 on v7x)."""
    try:
        info = pltpu.get_tpu_info()
    except Exception:
        return 1
    for name in ("num_cores", "num_tensorcores", "tensorcores_per_chip",
                 "cores_per_chip", "num_cores_per_chip"):
        v = getattr(info, name, None)
        if isinstance(v, int) and v >= 1:
            return v
    return 1


@functools.lru_cache(maxsize=None)
def _build_sum(n: int, c: int, dtype_name: str, tile_n: int,
               num_splits: int, core_parallel: bool):
    """pallas_call computing per-split partial sums of an (n, c) array.

    Output: (num_splits * 8, c) f32; row 8*s holds split s's column-wise partial
    sums (other rows are zero). The wrapper sums everything.
    """
    dtype = jnp.dtype(dtype_name)
    tiles_total = pl.cdiv(n, tile_n)
    tps = pl.cdiv(tiles_total, num_splits)          # tiles per split
    last_blk = tiles_total - 1
    # True if the logical grid covers more rows than exist (ragged last tile
    # and/or duplicated clamped blocks from an uneven split).
    need_mask = (num_splits * tps * tile_n) != n

    def kernel(x_ref, o_ref):
        i = pl.program_id(1)

        @pl.when(i == 0)
        def _init():
            o_ref[...] = jnp.zeros_like(o_ref)

        x = x_ref[...].astype(jnp.float32)

        if need_mask:
            blk = pl.program_id(0) * tps + i        # logical (unclamped) block

            @pl.when(blk < last_blk)
            def _full_tile():
                o_ref[0:1, :] += jnp.sum(x, axis=0, keepdims=True)

            @pl.when(blk >= last_blk)
            def _edge_tile():
                # Mask rows past the end of the array; also zeroes the clamped
                # duplicate blocks an uneven core-split may produce.
                start = blk * tile_n
                rows = jax.lax.broadcasted_iota(jnp.int32, (x.shape[0], 1), 0) + start
                xm = jnp.where(rows < n, x, 0.0)
                o_ref[0:1, :] += jnp.sum(xm, axis=0, keepdims=True)
        else:
            o_ref[0:1, :] += jnp.sum(x, axis=0, keepdims=True)

    in_spec = pl.BlockSpec(
        (tile_n, c),
        # Clamp so an uneven split never issues a fully out-of-bounds block DMA;
        # the in-kernel mask zeroes any duplicated contribution.
        lambda s, i: (jnp.minimum(s * tps + i, last_blk), 0),
    )
    out_spec = pl.BlockSpec((8, c), lambda s, i: (s, 0))

    if core_parallel:
        dim_sem = (pltpu.CORE_PARALLEL, pltpu.ARBITRARY)
    else:
        dim_sem = ("arbitrary", "arbitrary")

    return pl.pallas_call(
        kernel,
        out_shape=jax.ShapeDtypeStruct((num_splits * 8, c), jnp.float32),
        grid_spec=pltpu.PrefetchScalarGridSpec(
            num_scalar_prefetch=0,
            grid=(num_splits, tps),
            in_specs=[in_spec],
            out_specs=out_spec,
        ),
        compiler_params=pltpu.CompilerParams(
            dimension_semantics=dim_sem,
            vmem_limit_bytes=32 * 1024 * 1024,
        ),
        cost_estimate=pl.CostEstimate(
            flops=n * c,
            transcendentals=0,
            bytes_accessed=n * c * dtype.itemsize + num_splits * 8 * c * 4,
        ),
    )


def class_div(y_t: jax.Array, *, block_bytes: int = _DEFAULT_BLOCK_BYTES) -> jax.Array:
    """Pallas TPU equivalent of Class_div.forward. y_t: (N, C) float array."""
    assert y_t.ndim == 2, "expected (batch, classes)"
    n, c = y_t.shape
    dtype = jnp.dtype(y_t.dtype)
    itemsize = dtype.itemsize

    # Constants folded at trace time:  result = offset + scale * sum(y_t)
    offset = math.log(1.0 / c) / c
    scale = -1.0 / (n * c * c)

    # Dtype-scaled row tiling: keep each block ~block_bytes of VMEM regardless
    # of dtype width; rows are a multiple of the native sublane packing.
    sublane_mult = 8 * max(1, 4 // itemsize)           # 8 f32 / 16 bf16 / 32 int8
    row_bytes = _round_up(c, _LANES) * itemsize        # VMEM footprint per row
    max_rows = max(sublane_mult, (block_bytes // row_bytes) // sublane_mult * sublane_mult)
    tile_n = n if n <= max_rows else max_rows
    tiles_total = pl.cdiv(n, tile_n)

    # Split the reduction across TensorCores only where it can help (v7x).
    cores = _num_tensorcores()
    num_splits = cores if (cores > 1 and tiles_total >= cores) else 1

    def run(splits: int, core_par: bool) -> jax.Array:
        return _build_sum(n, c, dtype.name, tile_n, splits, core_par)(y_t)

    if num_splits > 1:
        try:
            partials = run(num_splits, True)
        except Exception:
            # CORE_PARALLEL unsupported on this chip / jax build: serial path.
            partials = run(1, False)
    else:
        partials = run(1, False)

    grand_sum = jnp.sum(partials)                       # tiny (num_splits*8, C)
    return jnp.float32(offset) + jnp.float32(scale) * grand_sum


def _reference(y_t: jax.Array) -> jax.Array:
    # Pure-JAX reference mirroring the torch semantics (probs fed to kl_div).
    msoftmax = jnp.mean(y_t.astype(jnp.float32), axis=0, keepdims=True)  # (1, C)
    c = y_t.shape[1]
    uni = 1.0 / c
    kl = uni * (jnp.log(jnp.float32(uni)) - msoftmax)
    return jnp.mean(kl)


if __name__ == "__main__":
    key = jax.random.PRNGKey(0)
    k0, k1, k2, k3 = jax.random.split(key, 4)

    # Small shape consistent with the module: a batch of softmax outputs.
    y1 = jax.nn.softmax(jax.random.normal(k0, (8, 32), jnp.float32), axis=-1)
    r1 = class_div(y1)
    jax.block_until_ready(r1)
    assert jnp.allclose(r1, _reference(y1), rtol=1e-5, atol=1e-6), (r1, _reference(y1))

    # Non-128-aligned class count; single large tile, no pad / no extra copy.
    y2 = jax.nn.softmax(jax.random.normal(k1, (4000, 301), jnp.float32), axis=-1)
    r2 = class_div(y2)
    jax.block_until_ready(r2)
    assert jnp.allclose(r2, _reference(y2), rtol=1e-4, atol=1e-6), (r2, _reference(y2))

    # Forced small blocks: multi-tile grid with a ragged, in-kernel-masked last tile.
    y3 = jax.nn.softmax(jax.random.normal(k2, (1000, 96), jnp.float32), axis=-1)
    r3 = class_div(y3, block_bytes=64 * 1024)
    jax.block_until_ready(r3)
    assert jnp.allclose(r3, _reference(y3), rtol=1e-4, atol=1e-6), (r3, _reference(y3))

    # bf16 input: dtype-scaled sublane tiling (16-row multiples), multi-tile.
    y4 = jax.nn.softmax(jax.random.normal(k3, (512, 128), jnp.float32), axis=-1).astype(jnp.bfloat16)
    r4 = class_div(y4, block_bytes=32 * 1024)
    jax.block_until_ready(r4)
    assert jnp.allclose(r4, _reference(y4), rtol=1e-3, atol=1e-5), (r4, _reference(y4))

    print("KERNEL_OK")
</pallas_src>

<mosaic_0001>
module attributes {stable_mosaic.version = 11 : i64} {
  func.func @kernel(%arg0: i32, %arg1: i32, %arg2: memref<8x32xf32, #tpu.memory_space<vmem>>, %arg3: memref<8x32xf32, #tpu.memory_space<vmem>>) attributes {dimension_semantics = [#tpu.dimension_semantics<arbitrary>, #tpu.dimension_semantics<arbitrary>], iteration_bounds = array<i64: 1, 1>, scalar_prefetch = 0 : i64, scratch_operands = 0 : i64, tpu.core_type = #tpu.core_type<tc>, window_params = [{transform_indices = @transform_0, window_bounds = array<i64: 8, 32>}, {transform_indices = @transform_1, window_bounds = array<i64: 8, 32>}]} {
    %c0_i32 = arith.constant 0 : i32
    %0 = arith.cmpi eq, %arg1, %c0_i32 : i32
    %1 = arith.extui %0 : i1 to i32
    %c0_i32_0 = arith.constant 0 : i32
    %2 = arith.cmpi ne, %1, %c0_i32_0 : i32
    scf.if %2 {
      %cst_6 = arith.constant 0.000000e+00 : f32
      %9 = vector.broadcast %cst_6 : f32 to vector<8x32xf32>
      %c0_7 = arith.constant 0 : index
      %c0_8 = arith.constant 0 : index
      %10 = vector.load %arg3[%c0_7, %c0_8] : memref<8x32xf32, #tpu.memory_space<vmem>>, vector<8x32xf32>
      tpu.vector_store %arg3[%c0_7, %c0_8], %9 {strides = array<i32>} : memref<8x32xf32, #tpu.memory_space<vmem>>, vector<8x32xf32>,
    } else {
    }
    %c0 = arith.constant 0 : index
    %c0_1 = arith.constant 0 : index
    %3 = vector.load %arg2[%c0, %c0_1] : memref<8x32xf32, #tpu.memory_space<vmem>>, vector<8x32xf32>
    %c0_2 = arith.constant 0 : index
    %c0_3 = arith.constant 0 : index
    %4 = vector.load %arg3[%c0_2, %c0_3] : memref<8x32xf32, #tpu.memory_space<vmem>>, vector<1x32xf32>
    %cst = arith.constant dense<0.000000e+00> : vector<32xf32>
    %5 = vector.multi_reduction <add>, %3, %cst [0] : vector<8x32xf32> to vector<32xf32>
    %6 = vector.shape_cast %5 : vector<32xf32> to vector<1x32xf32>
    %7 = arith.addf %4, %6 : vector<1x32xf32>
    %c0_4 = arith.constant 0 : index
    %c0_5 = arith.constant 0 : index
    %8 = vector.load %arg3[%c0_4, %c0_5] : memref<8x32xf32, #tpu.memory_space<vmem>>, vector<1x32xf32>
    tpu.vector_store %arg3[%c0_4, %c0_5], %7 {strides = array<i32>} : memref<8x32xf32, #tpu.memory_space<vmem>>, vector<1x32xf32>,
    return
  }
  func.func @transform_0(%arg0: i32, %arg1: i32) -> (i32, i32) {
    %c1_i32 = arith.constant 1 : i32
    %0 = arith.muli %arg0, %c1_i32 : i32
    %1 = arith.addi %0, %arg1 : i32
    %c0_i32 = arith.constant 0 : i32
    %2 = arith.minsi %1, %c0_i32 : i32
    %c0_i32_0 = arith.constant 0 : i32
    %c0_i32_1 = arith.constant 0 : i32
    return %2, %c0_i32_0 : i32, i32
  }
  func.func @transform_1(%arg0: i32, %arg1: i32) -> (i32, i32) {
    %c0_i32 = arith.constant 0 : i32
    %c0_i32_0 = arith.constant 0 : i32
    return %arg0, %c0_i32 : i32, i32
  }
}

</mosaic_0001>

<bundles_post_ra>
// kernel: tpu_custom_call.1
= control target key start
LH: loop header
LB: loop body
LE: loop exit
PB: predicated region body
PF: predicated region fallthrough
CT: control target
= control target key end

     0   :  { %6 = vsyncpa [#allocation3], 0  ;;  %s153_s0 = inlined_call_operand.hbm [shape: f32[8,32], index: 0, kind: input, shape index: {}]   ;;  %s154_s1 = inlined_call_operand.hbm [shape: f32[8,32], index: 1, kind: output, shape index: {}]  }
   0x1   :  { %7 = vsyncpa [#allocation4], 0  ;;  %s116_s6 = smov [#allocation2]   ;;  %s68_s10 = scalar_lea.hbm %s153_s0, 128 }
   0x2   :  { %s19_s7 = sshll.u32 %s116_s6, 4  ;;  %p69_p0 = scmp.ne.s32.totalorder %s153_s0, %s68_s10  ;;  %s20_s7 = int_to_ptr.vmem [resolvable:$true] %s19_s7 }
   0x3   :  { %p72_p1 = scmp.lt.u32.totalorder %s68_s10, %s153_s0 }
   0x5   :  { %p74_p2 = pnand %p72_p1, %p69_p0 }
   0x7   :  { %77 = shalt.err (!%p74_p2)
}
   0x8   :  { %s78_s15 = scalar_lea.vmem %s20_s7, 128  ;;  %p83_p4 = scmp.lt.s32.totalorder %s20_s7, %s20_s7 }
   0x9   :  { %p79_p3 = scmp.ne.s32.totalorder %s20_s7, %s78_s15  ;;  %p84_p5 = scmp.lt.s32.totalorder %s78_s15, %s78_s15 }
   0xb   :  { %p85_p6 = por %p84_p5, %p83_p4 }
   0xd   :  { %p86_p7 = pnand %p85_p6, %p79_p3 }
   0xf   :  { %89 = shalt.err (!%p86_p7)
}
  0x10   :  { %22 = dma.hbm_to_vmem [thread:$0]  %s153_s0, 128, %s20_s7, [#allocation3]  }
  0x11   :  { %112 = dma.done.wait [#allocation3], 128  }
  0x12   :  { %113 = vsyncadd [#allocation3], 4294967168  ;;  %vm33_vm0 = vcmask 261120   ;;  %v117_v0 = vmov 0.0   ;;  %v35_v1 = vld [vmem:[#allocation2] sm:$0xff]  ;;  %s118_s18 = smov [#allocation5]  }
  0x13   :  { %34 = vst.msk [vmem:[#allocation5] sm:$0xff] %vm33_vm0, %v117_v0  ;;  %v38_v2 = vsel %vm33_vm0, %v35_v1, 0.0  ;;  %s54_s19 = sshll.u32 %s118_s18, 4  ;;  %vm46_vm1 = vcmask 253952   ;;  %s55_s19 = int_to_ptr.vmem [resolvable:$true] %s54_s19 }
  0x14   :  { %v39_v3 = vrot.slane %v38_v2, 4  ;;  %s90_s0 = scalar_lea.vmem %s55_s19, 128  ;;  %p95_p9 = scmp.lt.s32.totalorder %s55_s19, %s55_s19 }
  0x15   :  { %p91_p8 = scmp.ne.s32.totalorder %s55_s19, %s90_s0  ;;  %p96_p10 = scmp.lt.s32.totalorder %s90_s0, %s90_s0 }
  0x16   :  { %v40_v4 = vadd.f32 %v39_v3, %v38_v2 }
  0x17   :  { %p97_p11 = por %p96_p10, %p95_p9 }
  0x18   :  { %v41_v5 = vrot.slane %v40_v4, 2 }
  0x19   :  { %p98_p12 = pnand %p97_p11, %p91_p8 }
  0x1a   :  { %v42_v6 = vadd.f32 %v41_v5, %v40_v4  ;;  %v36_v8 = vld [vmem:[#allocation5] sm:$0x1] }
  0x1c   :  { %v43_v7 = vrot.slane %v42_v6, 1 }
  0x1e   :  { %v44_v9 = vadd.f32 %v43_v7, %v42_v6 }
  0x20   :  { %v45_v10 = vadd.f32 %v44_v9, %v36_v8 }
  0x22   :  { %47 = vst.msk [vmem:[#allocation5] sm:$0x1] %vm46_vm1, %v45_v10 }
  0x23   :  { %101 = shalt.err (!%p98_p12)
}
  0x24   :  { %s102_s22 = scalar_lea.hbm %s154_s1, 128 }
  0x25   :  { %p103_p13 = scmp.ne.s32.totalorder %s154_s1, %s102_s22  ;;  %p106_p0 = scmp.lt.u32.totalorder %s102_s22, %s154_s1 }
  0x27   :  { %p108_p1 = pnand %p106_p0, %p103_p13 }
  0x29   :  { %111 = shalt.err (!%p108_p1)
}
  0x2a   :  { %57 = dma.vmem_to_hbm [thread:$0]  %s55_s19, 128, %s154_s1, [#allocation4]  }
  0x2b   :  { %114 = dma.done.wait [#allocation4], 128  }
  0x2c   :  { %115 = vsyncadd [#allocation4], 4294967168 }
  0x2d   :  { %61 = vsyncpa [#allocation3], 1 }
  0x2e   :  { %62 = vsyncpa [#allocation4], 1 }

</bundles_post_ra>
